<compile_context>
chip_gen: v6e
topology: v6e:2x2x1
jax: 0.10.0
libtpu: 0.0.40
codegen_flags: <defaults>
</compile_context>

<pallas_src>
import functools

import jax
import jax.numpy as jnp
from jax.experimental import pallas as pl
from jax.experimental.pallas import tpu as pltpu


# ----------------------------------------------------------------------------
# Kernel 1: two independent Linear(V)/Linear(U) matmuls + tanh/sigmoid gating
# + the (Fi -> 1) projection, producing one raw attention logit per patch row.
# ----------------------------------------------------------------------------
def _mil_logits_kernel(x_ref, wv_ref, bv_ref, wu_ref, bu_ref, ww_ref, bw_ref,
                       out_ref):
    # In-kernel cast: x stays f32 (or bf16) in HBM, MXU operands follow the
    # weight dtype.  Accumulation is always f32.
    x = x_ref[...].astype(wv_ref.dtype)                           # (tm, F)

    # Two independent MXU dots -> the scheduler can overlap one branch's
    # EUP/VPU epilogue with the other branch's MXU work.
    hv = jnp.dot(x, wv_ref[...],
                 preferred_element_type=jnp.float32) + bv_ref[...]   # (tm, Fi)
    hu = jnp.dot(x, wu_ref[...],
                 preferred_element_type=jnp.float32) + bu_ref[...]   # (tm, Fi)

    v = jnp.tanh(hv)                                              # EUP
    u = 0.5 * jnp.tanh(0.5 * hu) + 0.5                            # sigmoid via tanh
    gated = u * v                                                 # (tm, Fi)

    # Fi -> 1 projection on the VPU/XLU (lane reduce), not the MXU.
    att = jnp.sum(gated * ww_ref[...], axis=-1, keepdims=True)    # (tm, 1)
    out_ref[...] = att + bw_ref[0]                                # scalar from SMEM


# ----------------------------------------------------------------------------
# Kernel 2: masked softmax over the patch axis (the `nonpad is not None` path:
# softmax_0 over the first nonpad[b] patches, zeros for the padded tail).
# Batched: up to 8 bags (sublane-full block) per grid step.
# ----------------------------------------------------------------------------
def _masked_softmax_kernel(nonpad_ref, logits_ref, out_ref):
    k = nonpad_ref[...]                                           # (bb, 1) int32
    logits = logits_ref[...]                                      # (bb, pz) f32
    idx = jax.lax.broadcasted_iota(jnp.int32, logits.shape, 1)
    mask = idx < k                                                # broadcast (bb,1)
    neg = jnp.finfo(jnp.float32).min
    masked = jnp.where(mask, logits, neg)
    m = jnp.max(masked, axis=1, keepdims=True)
    e = jnp.where(mask, jnp.exp(masked - m), 0.0)
    # Clamp so nonpad[b]==0 (all-masked row) never produces NaN.
    s = jnp.maximum(jnp.sum(e, axis=1, keepdims=True),
                    jnp.finfo(jnp.float32).tiny)
    out_ref[...] = jnp.where(mask, e / s, 0.0)


# ----------------------------------------------------------------------------
# Wrappers
# ----------------------------------------------------------------------------
@functools.partial(jax.jit, static_argnames=("block_rows",))
def _compute_logits(x2, wv, bv, wu, bu, ww_row, bw_flat, *, block_rows):
    n, f = x2.shape
    fi = wv.shape[1]

    grid = (pl.cdiv(n, block_rows),)                 # ragged last block is OK
    out = pl.pallas_call(
        _mil_logits_kernel,
        out_shape=jax.ShapeDtypeStruct((n, 1), jnp.float32),
        grid=grid,
        in_specs=[
            pl.BlockSpec((block_rows, f), lambda i: (i, 0)),      # x tile
            pl.BlockSpec((f, fi), lambda i: (0, 0)),              # W_v
            pl.BlockSpec((1, fi), lambda i: (0, 0)),              # b_v
            pl.BlockSpec((f, fi), lambda i: (0, 0)),              # W_u
            pl.BlockSpec((1, fi), lambda i: (0, 0)),              # b_u
            pl.BlockSpec((1, fi), lambda i: (0, 0)),              # W_w row
            pl.BlockSpec(memory_space=pltpu.MemorySpace.SMEM),    # b_w scalar
        ],
        out_specs=pl.BlockSpec((block_rows, 1), lambda i: (i, 0)),
        compiler_params=pltpu.CompilerParams(
            dimension_semantics=("parallel",),
            vmem_limit_bytes=32 * 1024 * 1024,
        ),
    )(x2, wv, bv, wu, bu, ww_row, bw_flat)
    return out                                                     # (n, 1) f32


@jax.jit
def _masked_softmax(logits2, nonpad_col):
    bz, pz = logits2.shape
    bb = bz if bz < 8 else 8                          # sublane-full batch block
    return pl.pallas_call(
        _masked_softmax_kernel,
        out_shape=jax.ShapeDtypeStruct((bz, pz), jnp.float32),
        grid=(pl.cdiv(bz, bb),),
        in_specs=[
            pl.BlockSpec((bb, 1), lambda b: (b, 0)),              # nonpad column
            pl.BlockSpec((bb, pz), lambda b: (b, 0)),             # per-bag logits
        ],
        out_specs=pl.BlockSpec((bb, pz), lambda b: (b, 0)),
        compiler_params=pltpu.CompilerParams(
            dimension_semantics=("parallel",)),
    )(nonpad_col, logits2)


def init_params(key, feature_length=768, feature_inside=256):
    """Deterministic synthetic parameters (PyTorch-Linear-style uniform init)."""
    kv, kbv, ku, kbu, kw, kbw = jax.random.split(key, 6)
    s_in = 1.0 / jnp.sqrt(jnp.float32(feature_length))
    s_mid = 1.0 / jnp.sqrt(jnp.float32(feature_inside))
    wv = jax.random.uniform(kv, (feature_length, feature_inside), jnp.float32,
                            -s_in, s_in)
    bv = jax.random.uniform(kbv, (1, feature_inside), jnp.float32, -s_in, s_in)
    wu = jax.random.uniform(ku, (feature_length, feature_inside), jnp.float32,
                            -s_in, s_in)
    bu = jax.random.uniform(kbu, (1, feature_inside), jnp.float32, -s_in, s_in)
    ww = jax.random.uniform(kw, (feature_inside, 1), jnp.float32, -s_mid, s_mid)
    bw = jax.random.uniform(kbw, (1, 1), jnp.float32, -s_mid, s_mid)
    return wv, bv, wu, bu, ww, bw


def mil_attention(params, x, nonpad=None, *, block_rows=1024,
                  compute_dtype=jnp.bfloat16):
    """Pallas implementation of MILAttention.forward.  Returns (bz, 1, pz).

    compute_dtype: MXU operand dtype (weights cast in the wrapper, x cast
    inside the kernel); f32 accumulation is kept via preferred_element_type.
    Use None / jnp.float32 for the exact f32 path.  bf16 trades a small logit
    error (which can visibly shift near-tied softmax weights) for ~3x MXU
    throughput on v5e/v7x and halved x traffic if x is already bf16-resident.
    For repeated calls, pre-cast / pre-reshape the params once outside.
    """
    wv, bv, wu, bu, ww, bw = params
    if x.ndim == 3:
        bz, pz, fz = x.shape
    else:
        bz, pz, fz = 1, x.shape[0], x.shape[1]

    if nonpad is None:
        # Faithful to the PyTorch code: softmax_1 over `att` of shape
        # (bz*pz, 1) along dim=1 normalizes each row over a single element,
        # so the result is identically 1.0 -> skip all kernel work.
        return jnp.ones((bz, 1, pz), jnp.float32)

    n = bz * pz
    x2 = x.reshape(n, fz)                                  # no dtype cast here

    cd = jnp.float32 if compute_dtype is None else compute_dtype
    wv_c = wv.astype(cd)                                   # small (~F*Fi) casts
    wu_c = wu.astype(cd)
    bv_f = bv.reshape(1, -1).astype(jnp.float32)
    bu_f = bu.reshape(1, -1).astype(jnp.float32)
    ww_row = ww.reshape(1, -1).astype(jnp.float32)         # Fi ideally %128 == 0
    bw_flat = bw.reshape((1,)).astype(jnp.float32)         # SMEM scalar

    # Row-tile selection: large MXU-friendly tiles, multiple of 8, but capped
    # at ~ceil(n/2) for moderate/large n so the grid has >=2 steps and both
    # v7x TensorCores are used ("parallel" axis).  No padding of x: the last
    # tile may be ragged.
    br = max(8, (int(block_rows) // 8) * 8)
    if n > 256:
        half = (((n + 1) // 2 + 7) // 8) * 8
        br = min(br, half)
    br = min(br, ((n + 7) // 8) * 8)
    br = max(8, br)

    logits = _compute_logits(x2, wv_c, bv_f, wu_c, bu_f, ww_row, bw_flat,
                             block_rows=br)                # (n, 1) f32

    nonpad_col = jnp.asarray(nonpad, jnp.int32).reshape(bz, 1)
    probs = _masked_softmax(logits.reshape(bz, pz), nonpad_col)   # (bz, pz)
    return probs.reshape(bz, 1, pz)


# ----------------------------------------------------------------------------
# Pure-JAX reference (mirrors the PyTorch forward) for verification.
# ----------------------------------------------------------------------------
def ref_forward(params, x, nonpad=None):
    wv, bv, wu, bu, ww, bw = params
    bz, pz, fz = x.shape
    x2 = x.reshape(-1, fz)
    v = jnp.tanh(x2 @ wv + bv)
    u = jax.nn.sigmoid(x2 @ wu + bu)
    att = (u * v) @ ww + bw                                  # (bz*pz, 1)
    if nonpad is None:
        return jax.nn.softmax(att, axis=1).reshape(bz, 1, pz)
    w = att.reshape(bz, pz)
    out = []
    for b in range(bz):
        k = int(nonpad[b])
        valid = jax.nn.softmax(w[b, :k], axis=0)
        out.append(jnp.concatenate([valid, jnp.zeros(pz - k)], axis=0))
    return jnp.stack(out).reshape(bz, 1, pz)


if __name__ == "__main__":
    feature_length, feature_inside = 64, 128

    key = jax.random.PRNGKey(0)
    k_param, k_x1, k_x2, k_x3 = jax.random.split(key, 4)
    params = init_params(k_param, feature_length, feature_inside)

    # --- Test 1: small single-tile shapes, both nonpad paths (f32) ---------
    bz, pz = 2, 8
    x = jax.random.normal(k_x1, (bz, pz, feature_length), jnp.float32)

    out_none = jax.block_until_ready(mil_attention(params, x, nonpad=None))
    ref_none = ref_forward(params, x, nonpad=None)
    assert out_none.shape == (bz, 1, pz)
    assert jnp.allclose(out_none, ref_none, atol=1e-6)

    nonpad = jnp.array([5, 8], dtype=jnp.int32)
    out_np = jax.block_until_ready(
        mil_attention(params, x, nonpad=nonpad, compute_dtype=jnp.float32))
    ref_np = ref_forward(params, x, nonpad=nonpad)
    assert out_np.shape == (bz, 1, pz)
    assert jnp.allclose(out_np, ref_np, atol=1e-4)

    # --- Test 2: multi-tile grid with ragged last row-block (f32) ----------
    # n = 1046 rows -> br = 528, grid = 2 (last block ragged, 518 valid rows).
    bz2, pz2 = 2, 523
    x_big = jax.random.normal(k_x2, (bz2, pz2, feature_length), jnp.float32)
    nonpad2 = jnp.array([300, 523], dtype=jnp.int32)
    out_big = jax.block_until_ready(
        mil_attention(params, x_big, nonpad=nonpad2, compute_dtype=jnp.float32))
    ref_big = ref_forward(params, x_big, nonpad=nonpad2)
    assert out_big.shape == (bz2, 1, pz2)
    assert jnp.allclose(out_big, ref_big, atol=1e-4)

    # --- Test 3: default bf16 MXU-operand path (looser tolerance) ----------
    out_bf16 = jax.block_until_ready(mil_attention(params, x_big, nonpad=nonpad2))
    assert out_bf16.shape == (bz2, 1, pz2)
    assert float(jnp.max(jnp.abs(out_bf16 - ref_big))) < 5e-2

    # --- Test 4: batched masked softmax with bz > 8 (ragged batch block) ---
    bz3, pz3 = 10, 128
    x_b = jax.random.normal(k_x3, (bz3, pz3, feature_length), jnp.float32)
    nonpad3 = jnp.arange(1, bz3 + 1, dtype=jnp.int32) * 12   # 12 .. 120
    out_b = jax.block_until_ready(
        mil_attention(params, x_b, nonpad=nonpad3, compute_dtype=jnp.float32))
    ref_b = ref_forward(params, x_b, nonpad=nonpad3)
    assert out_b.shape == (bz3, 1, pz3)
    assert jnp.allclose(out_b, ref_b, atol=1e-4)

    print("KERNEL_OK")
</pallas_src>

<mosaic_0001>
module attributes {stable_mosaic.version = 11 : i64} {
  func.func @_mil_logits_kernel(%arg0: i32, %arg1: memref<16x64xf32, #tpu.memory_space<vmem>>, %arg2: memref<64x128xf32, #tpu.memory_space<vmem>>, %arg3: memref<1x128xf32, #tpu.memory_space<vmem>>, %arg4: memref<64x128xf32, #tpu.memory_space<vmem>>, %arg5: memref<1x128xf32, #tpu.memory_space<vmem>>, %arg6: memref<1x128xf32, #tpu.memory_space<vmem>>, %arg7: memref<1xf32, #tpu.memory_space<smem>>, %arg8: memref<16x1xf32, #tpu.memory_space<vmem>>) attributes {dimension_semantics = [#tpu.dimension_semantics<parallel>], iteration_bounds = array<i64: 1>, scalar_prefetch = 0 : i64, scratch_operands = 0 : i64, tpu.core_type = #tpu.core_type<tc>, window_params = [{transform_indices = @transform_0, window_bounds = array<i64: 16, 64>}, {pipeline_mode = #tpu.pipeline_mode<synchronous>, transform_indices = @transform_1, window_bounds = array<i64: 64, 128>}, {pipeline_mode = #tpu.pipeline_mode<synchronous>, transform_indices = @transform_2, window_bounds = array<i64: 1, 128>}, {pipeline_mode = #tpu.pipeline_mode<synchronous>, transform_indices = @transform_3, window_bounds = array<i64: 64, 128>}, {pipeline_mode = #tpu.pipeline_mode<synchronous>, transform_indices = @transform_4, window_bounds = array<i64: 1, 128>}, {pipeline_mode = #tpu.pipeline_mode<synchronous>, transform_indices = @transform_5, window_bounds = array<i64: 1, 128>}, {transform_indices = @transform_6, window_bounds = array<i64: 1>}, {transform_indices = @transform_7, window_bounds = array<i64: 16, 1>}]} {
    %c0 = arith.constant 0 : index
    %c0_0 = arith.constant 0 : index
    %0 = vector.load %arg1[%c0, %c0_0] : memref<16x64xf32, #tpu.memory_space<vmem>>, vector<16x64xf32>
    %c0_1 = arith.constant 0 : index
    %c0_2 = arith.constant 0 : index
    %1 = vector.load %arg2[%c0_1, %c0_2] : memref<64x128xf32, #tpu.memory_space<vmem>>, vector<64x128xf32>
    %cst = arith.constant dense<0.000000e+00> : vector<16x128xf32>
    %2 = tpu.matmul %0, %1, %cst {dimension_numbers = #tpu.dot_dimension_numbers<[1], [0], [0], [1], [0, 0, 1, 1], [], []>} : vector<16x64xf32>, vector<64x128xf32>, vector<16x128xf32> -> vector<16x128xf32>
    %c0_3 = arith.constant 0 : index
    %c0_4 = arith.constant 0 : index
    %3 = vector.load %arg3[%c0_3, %c0_4] : memref<1x128xf32, #tpu.memory_space<vmem>>, vector<1x128xf32>
    %4 = vector.broadcast %3 : vector<1x128xf32> to vector<16x128xf32>
    %5 = arith.addf %2, %4 : vector<16x128xf32>
    %c0_5 = arith.constant 0 : index
    %c0_6 = arith.constant 0 : index
    %6 = vector.load %arg4[%c0_5, %c0_6] : memref<64x128xf32, #tpu.memory_space<vmem>>, vector<64x128xf32>
    %cst_7 = arith.constant dense<0.000000e+00> : vector<16x128xf32>
    %7 = tpu.matmul %0, %6, %cst_7 {dimension_numbers = #tpu.dot_dimension_numbers<[1], [0], [0], [1], [0, 0, 1, 1], [], []>} : vector<16x64xf32>, vector<64x128xf32>, vector<16x128xf32> -> vector<16x128xf32>
    %c0_8 = arith.constant 0 : index
    %c0_9 = arith.constant 0 : index
    %8 = vector.load %arg5[%c0_8, %c0_9] : memref<1x128xf32, #tpu.memory_space<vmem>>, vector<1x128xf32>
    %9 = vector.broadcast %8 : vector<1x128xf32> to vector<16x128xf32>
    %10 = arith.addf %7, %9 : vector<16x128xf32>
    %11 = math.tanh %5 : vector<16x128xf32>
    %cst_10 = arith.constant 5.000000e-01 : f32
    %12 = vector.broadcast %cst_10 : f32 to vector<16x128xf32>
    %13 = arith.mulf %12, %10 : vector<16x128xf32>
    %14 = math.tanh %13 : vector<16x128xf32>
    %cst_11 = arith.constant 5.000000e-01 : f32
    %15 = vector.broadcast %cst_11 : f32 to vector<16x128xf32>
    %16 = arith.mulf %15, %14 : vector<16x128xf32>
    %cst_12 = arith.constant 5.000000e-01 : f32
    %17 = vector.broadcast %cst_12 : f32 to vector<16x128xf32>
    %18 = arith.addf %16, %17 : vector<16x128xf32>
    %19 = arith.mulf %18, %11 : vector<16x128xf32>
    %c0_13 = arith.constant 0 : index
    %c0_14 = arith.constant 0 : index
    %20 = vector.load %arg6[%c0_13, %c0_14] : memref<1x128xf32, #tpu.memory_space<vmem>>, vector<1x128xf32>
    %21 = vector.broadcast %20 : vector<1x128xf32> to vector<16x128xf32>
    %22 = arith.mulf %19, %21 : vector<16x128xf32>
    %cst_15 = arith.constant dense<0.000000e+00> : vector<16xf32>
    %23 = vector.multi_reduction <add>, %22, %cst_15 [1] : vector<16x128xf32> to vector<16xf32>
    %24 = vector.shape_cast %23 : vector<16xf32> to vector<16x1xf32>
    %c0_16 = arith.constant 0 : index
    %25 = memref.load %arg7[%c0_16] : memref<1xf32, #tpu.memory_space<smem>>
    %26 = vector.broadcast %25 : f32 to vector<16x1xf32>
    %27 = arith.addf %24, %26 : vector<16x1xf32>
    %c0_17 = arith.constant 0 : index
    %c0_18 = arith.constant 0 : index
    %28 = vector.load %arg8[%c0_17, %c0_18] : memref<16x1xf32, #tpu.memory_space<vmem>>, vector<16x1xf32>
    tpu.vector_store %arg8[%c0_17, %c0_18], %27 {strides = array<i32>} : memref<16x1xf32, #tpu.memory_space<vmem>>, vector<16x1xf32>,
    return
  }
  func.func @transform_0(%arg0: i32) -> (i32, i32) {
    %c0_i32 = arith.constant 0 : i32
    %c0_i32_0 = arith.constant 0 : i32
    return %arg0, %c0_i32 : i32, i32
  }
  func.func @transform_1(%arg0: i32) -> (i32, i32) {
    %c0_i32 = arith.constant 0 : i32
    %c0_i32_0 = arith.constant 0 : i32
    %c0_i32_1 = arith.constant 0 : i32
    return %c0_i32, %c0_i32_0 : i32, i32
  }
  func.func @transform_2(%arg0: i32) -> (i32, i32) {
    %c0_i32 = arith.constant 0 : i32
    %c0_i32_0 = arith.constant 0 : i32
    %c0_i32_1 = arith.constant 0 : i32
    return %c0_i32, %c0_i32_0 : i32, i32
  }
  func.func @transform_3(%arg0: i32) -> (i32, i32) {
    %c0_i32 = arith.constant 0 : i32
    %c0_i32_0 = arith.constant 0 : i32
    %c0_i32_1 = arith.constant 0 : i32
    return %c0_i32, %c0_i32_0 : i32, i32
  }
  func.func @transform_4(%arg0: i32) -> (i32, i32) {
    %c0_i32 = arith.constant 0 : i32
    %c0_i32_0 = arith.constant 0 : i32
    %c0_i32_1 = arith.constant 0 : i32
    return %c0_i32, %c0_i32_0 : i32, i32
  }
  func.func @transform_5(%arg0: i32) -> (i32, i32) {
    %c0_i32 = arith.constant 0 : i32
    %c0_i32_0 = arith.constant 0 : i32
    %c0_i32_1 = arith.constant 0 : i32
    return %c0_i32, %c0_i32_0 : i32, i32
  }
  func.func @transform_6(%arg0: i32) -> i32 {
    %c0_i32 = arith.constant 0 : i32
    %c0_i32_0 = arith.constant 0 : i32
    return %c0_i32 : i32
  }
  func.func @transform_7(%arg0: i32) -> (i32, i32) {
    %c0_i32 = arith.constant 0 : i32
    %c0_i32_0 = arith.constant 0 : i32
    return %arg0, %c0_i32 : i32, i32
  }
}

</mosaic_0001>

<bundles_post_ra>
// kernel: _compute_logits.1
= control target key start
LH: loop header
LB: loop body
LE: loop exit
PB: predicated region body
PF: predicated region fallthrough
CT: control target
= control target key end

     0   :  { %13 = vsyncpa [#allocation4], 0  ;;  %s513_s0 = inlined_call_operand.hbm [shape: f32[16,64], index: 0, kind: input, shape index: {}]   ;;  %s514_s1 = inlined_call_operand.hbm [shape: f32[64,128], index: 1, kind: input, shape index: {}]   ;;  %s515_s2 = inlined_call_operand.vmem [shape: f32[1,128], index: 2, kind: input, shape index: {}]   ;;  %s516_s3 = inlined_call_operand.hbm [shape: f32[64,128], index: 3, kind: input, shape index: {}]   ;;  %s517_s4 = inlined_call_operand.vmem [shape: f32[1,128], index: 4, kind: input, shape index: {}]   ;;  %s518_s5 = inlined_call_operand.vmem [shape: f32[1,128], index: 5, kind: input, shape index: {}]   ;;  %s519_s6 = inlined_call_operand.<no memory space> [shape: f32[1], index: 6, kind: input, shape index: {}]   ;;  %s520_s7 = inlined_call_operand.vmem [shape: f32[16,1], index: 7, kind: output, shape index: {}]  }
   0x1   :  { %14 = vsyncpa [#allocation6], 0  ;;  %s437_s24 = smov [#allocation5]   ;;  %s438_s26 = smov [#allocation3]  }
   0x2   :  { %s32_s25 = sshll.u32 %s437_s24, 4  ;;  %s20_s27 = sshll.u32 %s438_s26, 4  ;;  %s33_s25 = int_to_ptr.vmem [resolvable:$true] %s32_s25  ;;  %s21_s27 = int_to_ptr.vmem [resolvable:$true] %s20_s27 }
   0x3   :  { %s381_s28 = scalar_lea.vmem %s33_s25, 1024  ;;  %p386_p1 = scmp.lt.s32.totalorder %s33_s25, %s33_s25 }
   0x4   :  { %p382_p0 = scmp.ne.s32.totalorder %s33_s25, %s381_s28  ;;  %p387_p2 = scmp.lt.s32.totalorder %s381_s28, %s381_s28 }
   0x6   :  { %p388_p3 = por %p387_p2, %p386_p1 }
   0x8   :  { %p389_p4 = pnand %p388_p3, %p382_p0 }
   0xa   :  { %392 = shalt.err (!%p389_p4)
}
   0xb   :  { %s439_s29 = smov 128   ;;  %s440_s30 = smov 8  }
   0xc   :  { %38 = dma.hbm_to_vmem [thread:$0]  %s514_s1, 1024, %s33_s25, [#allocation6], %s439_s29, %s439_s29, %s440_s30  }
   0xd   :  { %s401_s10 = scalar_lea.vmem %s21_s27, 256  ;;  %p406_p6 = scmp.lt.s32.totalorder %s21_s27, %s21_s27 }
   0xe   :  { %p402_p5 = scmp.ne.s32.totalorder %s21_s27, %s401_s10  ;;  %p407_p7 = scmp.lt.s32.totalorder %s401_s10, %s401_s10 }
  0x10   :  { %p408_p8 = por %p407_p7, %p406_p6 }
  0x12   :  { %p409_p9 = pnand %p408_p8, %p402_p5 }
  0x14   :  { %412 = shalt.err (!%p409_p9)
}
  0x15   :  { %26 = dma.hbm_to_vmem [thread:$0]  %s513_s0, 256, %s21_s27, [#allocation4], %s439_s29, %s439_s29, %s440_s30  }
  0x16   :  { %s441_s13 = smov [#allocation7]  }
  0x17   :  { %s46_s14 = sshll.u32 %s441_s13, 4  ;;  %s47_s14 = int_to_ptr.vmem [resolvable:$true] %s46_s14 }
  0x18   :  { %s421_s15 = scalar_lea.vmem %s47_s14, 1024  ;;  %p426_p11 = scmp.lt.s32.totalorder %s47_s14, %s47_s14 }
  0x19   :  { %p422_p10 = scmp.ne.s32.totalorder %s47_s14, %s421_s15  ;;  %p427_p12 = scmp.lt.s32.totalorder %s421_s15, %s421_s15 }
  0x1b   :  { %p428_p13 = por %p427_p12, %p426_p11 }
  0x1d   :  { %p429_p0 = pnand %p428_p13, %p422_p10 }
  0x1f   :  { %432 = shalt.err (!%p429_p0)
}
  0x20   :  { %52 = dma.hbm_to_vmem [thread:$0]  %s516_s3, 1024, %s47_s14, [#allocation6], %s439_s29, %s439_s29, %s440_s30  }
  0x21   :  { %433 = dma.done.wait [#allocation4], 256  }
  0x22   :  { %434 = vsyncadd [#allocation4], 4294967040 }
  0x23   :  { %435 = dma.done.wait [#allocation6], 2048  }
  0x24   :  { %436 = vsyncadd [#allocation6], 4294965248  ;;  %v174_v0 = vld [vmem:[#allocation7 + $0x38] sm:$0xff]  ;;  %v173_v1 = vld [vmem:[#allocation7 + $0x30] sm:$0xff]  ;;  %vm85_vm0 = vcmask 523264   ;;  %v283_v43 = vstv %s519_s6  ;;  %vm286_vm1 = vcmask 7168  }
  0x25   :  { %v77_v2 = vld [vmem:[#allocation5 + $0x38] sm:$0xff]  ;;  %341 = vmatprep.subr.mxu1 %v174_v0  ;;  %v76_v3 = vld [vmem:[#allocation5 + $0x30] sm:$0xff]  ;;  %v172_v4 = vld [vmem:[#allocation7 + $0x28] sm:$0xff] }
  0x26   :  { %322 = vmatprep.subr.mxu0 %v77_v2  ;;  %342 = vmatpush3.msra.mxu1 %v174_v0  ;;  %v75_v5 = vld [vmem:[#allocation5 + $0x28] sm:$0xff]  ;;  %v171_v6 = vld [vmem:[#allocation7 + $0x20] sm:$0xff]  ;;  %v170_v8 = vld [vmem:[#allocation7 + $0x18] sm:$0xff] }
  0x27   :  { %323 = vmatpush3.msra.mxu0 %v77_v2  ;;  %343 = vmatprep.subr.mxu1 %v173_v1  ;;  %v74_v7 = vld [vmem:[#allocation5 + $0x20] sm:$0xff]  ;;  %v73_v9 = vld [vmem:[#allocation5 + $0x18] sm:$0xff]  ;;  %v169_v10 = vld [vmem:[#allocation7 + $0x10] sm:$0xff] }
  0x28   :  { %324 = vmatprep.subr.mxu0 %v76_v3  ;;  %344 = vmatpush3.msra.mxu1 %v173_v1  ;;  %v72_v11 = vld [vmem:[#allocation5 + $0x10] sm:$0xff]  ;;  %v168_v12 = vld [vmem:[#allocation7 + $0x8] sm:$0xff]  ;;  %v167_v15 = vld [vmem:[#allocation7] sm:$0xff] }
  0x29   :  { %325 = vmatpush3.msra.mxu0 %v76_v3  ;;  %345 = vmatprep.subr.mxu1 %v172_v4  ;;  %v68_v13 = vld [vmem:[#allocation3] sm:$0xff]  ;;  %v71_v14 = vld [vmem:[#allocation5 + $0x8] sm:$0xff]  ;;  %v70_v16 = vld [vmem:[#allocation5] sm:$0xff] }
  0x2a   :  { %326 = vmatprep.subr.mxu0 %v75_v5  ;;  %346 = vmatpush3.msra.mxu1 %v172_v4  ;;  %v69_v17 = vld [vmem:[#allocation3 + $0x8] sm:$0xff]  ;;  %v298_v18 = vld [vmem:[%s517_s4] ss:$0 sm:$0xff] }
  0x2b   :  { %327 = vmatpush3.msra.mxu0 %v75_v5  ;;  %347 = vmatprep.subr.mxu1 %v171_v6  ;;  %v295_v25 = vld [vmem:[%s515_s2] ss:$0 sm:$0xff] }
  0x2c   :  { %328 = vmatprep.subr.mxu0 %v74_v7  ;;  %348 = vmatpush3.msra.mxu1 %v171_v6  ;;  %v301_v39 = vld [vmem:[%s518_s5] ss:$0 sm:$0xff] }
  0x2d   :  { %329 = vmatpush3.msra.mxu0 %v74_v7  ;;  %349 = vmatprep.subr.mxu1 %v170_v8 }
  0x2e   :  { %330 = vmatprep.subr.mxu0 %v73_v9  ;;  %350 = vmatpush3.msra.mxu1 %v170_v8 }
  0x2f   :  { %331 = vmatpush3.msra.mxu0 %v73_v9  ;;  %351 = vmatprep.subr.mxu1 %v169_v10 }
  0x30   :  { %332 = vmatprep.subr.mxu0 %v72_v11  ;;  %352 = vmatpush3.msra.mxu1 %v169_v10 }
  0x31   :  { %333 = vmatpush3.msra.mxu0 %v72_v11  ;;  %353 = vmatprep.subr.mxu1 %v168_v12 }
  0x32   :  { %357 = vmatprep.mubr.msk.f32.mxu1 %vm85_vm0, %v68_v13  ;;  %354 = vmatpush3.msra.mxu1 %v168_v12 }
  0x33   :  { %334 = vmatprep.subr.mxu0 %v71_v14  ;;  %355 = vmatprep.subr.mxu1 %v167_v15 }
  0x34   :  { %335 = vmatpush3.msra.mxu0 %v71_v14  ;;  %356 = vmatpush3.msra.mxu1 %v167_v15 }
  0x35   :  { %336 = vmatprep.subr.mxu0 %v70_v16  ;;  %358 = vmatmul.mubr.msk.f32.vlgmr.msra.gmra.mxu1 %vm85_vm0, %v69_v17 }
  0x36   :  { %337 = vmatpush3.msra.mxu0 %v70_v16  ;;  %338 = vmatprep.mubr.msk.f32.mxu0 %vm85_vm0, %v68_v13 }
  0x37   :  { %339 = vmatmul.mubr.msk.f32.vlgmr.msra.gmra.mxu0 %vm85_vm0, %v69_v17 }
  0xf5   :  { %v359_v19 = vpop.f32.mrf.mxu1 }
  0xf6   :  { %v254_v20 = vadd.f32 %v359_v19, %v298_v18 }
  0xf7   :  { %v248_v21 = vpop.f32.mrf.mxu1  ;;  %v340_v22 = vpop.f32.mrf.mxu0 }
  0xf8   :  { %v260_v23 = vmul.f32 0.5, %v254_v20  ;;  %v249_v24 = vadd.f32 %v298_v18, %v248_v21  ;;  %v164_v28 = vadd.f32 %v340_v22, %v295_v25 }
  0xf9   :  { %v158_v26 = vpop.f32.mrf.mxu0 }
  0xfa   :  { %365 = vtanh.f32 %v260_v23  ;;  %v259_v27 = vmul.f32 0.5, %v249_v24  ;;  %v159_v29 = vadd.f32 %v295_v25, %v158_v26 }
  0xfc   :  { %367 = vtanh.f32 %v259_v27 }
  0xfd   :  { %369 = vtanh.f32 %v164_v28 }
  0xfe   :  { %371 = vtanh.f32 %v159_v29 }
 0x107   :  { %v366_v30 = vpop.eup %365 }
 0x108   :  { %v264_v31 = vmul.f32 0.5, %v366_v30 }
 0x109   :  { %v368_v32 = vpop.eup %367 }
 0x10a   :  { %v263_v33 = vmul.f32 0.5, %v368_v32  ;;  %v370_v34 = vpop.eup %369  ;;  %v266_v36 = vadd.f32 0.5, %v264_v31 }
 0x10b   :  { %v372_v37 = vpop.eup %371 }
 0x10c   :  { %v265_v35 = vadd.f32 0.5, %v263_v33  ;;  %v268_v41 = vmul.f32 %v370_v34, %v266_v36 }
 0x10e   :  { %v267_v38 = vmul.f32 %v372_v37, %v265_v35  ;;  %v277_v42 = vmul.f32 %v301_v39, %v268_v41 }
 0x110   :  { %v276_v40 = vmul.f32 %v301_v39, %v267_v38 }
 0x112   :  { %278 = vadd.xlane.f32.xlu0 %v276_v40 }
 0x116   :  { %280 = vadd.xlane.f32.xlu0 %v277_v42 }
 0x19b   :  { %v279_v44 = vpop.xlane.xlu0 %278 }
 0x19c   :  { %v284_v45 = vadd.f32 %v283_v43, %v279_v44 }
 0x19e   :  { %287 = vst.msk [vmem:[%s520_s7] sm:$0xff] %vm286_vm1, %v284_v45 }
 0x19f   :  { %v281_v46 = vpop.xlane.xlu0 %280 }
 0x1a0   :  { %v285_v47 = vadd.f32 %v283_v43, %v281_v46 }
 0x1a2   :  { %288 = vst.msk [vmem:[%s520_s7 + $0x8] sm:$0xff] %vm286_vm1, %v285_v47 }
 0x1a3   :  { %293 = vsyncpa [#allocation4], 1 }
 0x1a4   :  { %294 = vsyncpa [#allocation6], 1 }

</bundles_post_ra>
